<compile_context>
chip_gen: v7x
topology: tpu7x:2x2x1
jax: 0.10.0
libtpu: 0.0.40
codegen_flags: <defaults>
</compile_context>

<pallas_src>
import jax
import jax.numpy as jnp
from jax.experimental import pallas as pl
from jax.experimental.pallas import tpu as pltpu

B, T = 2, 8
VOCAB = 32       # vocab_size (feature dim of src)
D_MODEL = 32     # d_model (== out_dim since concat=False)
SPK_DIM = 16     # spk_emb_dim (x_vector)
OUT_SIZE = 16    # out_size
N_EMBED = 20     # Quantize codebook size
NPAD = 32        # codebook padded to 32 codes (padded codes get +huge distance)

# ---- row offsets inside the two packed parameter blobs (starts 8-row aligned) ----
# Blob A (lane = OUT_SIZE): everything folded through the output projection.
A_MAIN = 0                          # (VOCAB+D_MODEL, OUT) = [W1^T Wo^T ; W2^T Wo^T]
A_WXO = A_MAIN + VOCAB + D_MODEL    # (SPK_DIM, OUT)       = Wx^T Wo^T
A_WOT = A_WXO + SPK_DIM             # (D_MODEL, OUT)       = Wo^T (quantize path)
A_BOF = A_WOT + D_MODEL             # (1, OUT)             = (b1+b2+bx) Wo^T + bo
A_ROWS = A_BOF + 1                  # 113

# Blob B (lane = D_MODEL): VQ branch (1x1 conv folded with time-mean + codebook).
B_WVQ = 0            # (VOCAB+D_MODEL, D) = [Wvq^T ; 0]  (zero rows kill the vao lanes)
B_BVQ = 64           # (1, D)
B_EMB = 72           # (D, NPAD)  codebook, padded codes zeroed
B_ESQ = 104          # (1, NPAD)  ||e||^2 per code, padded codes = 1e30
B_EMBT = 112         # (NPAD, D)  codebook^T, padded rows zeroed
B_ROWS = 144


# ---------------------------------------------------------------------------
# Single fused, single-program kernel.  Everything (tiny) stays resident in
# VMEM; scalar results go straight to SMEM.
# ---------------------------------------------------------------------------
def _fused_kernel(x_ref, spk_ref, pa_ref, pb_ref, out_ref, ind_ref, diff_ref):
    x = x_ref[...]        # (B*T, VOCAB+D_MODEL) = [src | vao]
    spk = spk_ref[...]    # (B, SPK_DIM)

    # --- per-batch time-mean via static sublane-aligned slice reductions ----
    sum0 = jnp.sum(x[0:T, :], axis=0, keepdims=True)        # batch 0
    sum1 = jnp.sum(x[T:2 * T, :], axis=0, keepdims=True)    # batch 1
    x_mean = jnp.concatenate([sum0, sum1], axis=0) * (1.0 / T)   # (B, VOCAB+D_MODEL)

    # --- VQ branch: 1x1 conv folded with the time-mean -----------------------
    vq = (jnp.dot(x_mean, pb_ref[B_WVQ:B_WVQ + VOCAB + D_MODEL, :],
                  preferred_element_type=jnp.float32)
          + pb_ref[B_BVQ:B_BVQ + 1, :])                           # (B, D)

    # distance to codebook; ||v||^2 dropped (constant per row, argmin unchanged)
    dist = (-2.0 * jnp.dot(vq, pb_ref[B_EMB:B_EMB + D_MODEL, :],
                           preferred_element_type=jnp.float32)
            + pb_ref[B_ESQ:B_ESQ + 1, :])                         # (B, NPAD)

    lane_ids = jax.lax.broadcasted_iota(jnp.int32, (B, NPAD), 1)
    row_ids = jax.lax.broadcasted_iota(jnp.int32, (B, NPAD), 0)
    is_min = dist == jnp.min(dist, axis=1, keepdims=True)
    # first-argmin (matches torch (-dist).max(1) tie-breaking)
    idx_col = jnp.min(jnp.where(is_min, lane_ids, NPAD), axis=1, keepdims=True)  # (B, 1)
    onehot = (lane_ids == idx_col).astype(jnp.float32)                           # (B, NPAD)
    # codebook lookup as a plain matmul against the pre-transposed codebook
    quant = jnp.dot(onehot, pb_ref[B_EMBT:B_EMBT + NPAD, :],
                    preferred_element_type=jnp.float32)                          # (B, D)

    # --- scalar outputs straight to SMEM ------------------------------------
    diff_ref[0] = jnp.sum((quant - vq) ** 2) * (1.0 / (B * D_MODEL))
    for b in range(B):  # B == 2, static unroll
        ind_ref[b] = jnp.min(jnp.where(is_min & (row_ids == b), lane_ids, NPAD))

    # --- main path folded through the identity encoder into `out` -----------
    # TODO(synk): Encoder / ConformerEncoder body is not provided in the source
    # module; treated as an identity pass-through (src_mask unused).  The
    # algebraic fold below is exact only under that assumption.
    main = jnp.dot(x, pa_ref[A_MAIN:A_MAIN + VOCAB + D_MODEL, :],
                   preferred_element_type=jnp.float32)            # (B*T, OUT)
    brow = (jnp.dot(spk, pa_ref[A_WXO:A_WXO + SPK_DIM, :],
                    preferred_element_type=jnp.float32)
            + jnp.dot(quant, pa_ref[A_WOT:A_WOT + D_MODEL, :],
                      preferred_element_type=jnp.float32)
            + pa_ref[A_BOF:A_BOF + 1, :])                         # (B, OUT)

    # per-batch broadcast over T via two static sublane-aligned slice adds
    out_ref[0:T, :] = main[0:T, :] + brow[0:1, :]
    out_ref[T:2 * T, :] = main[T:2 * T, :] + brow[1:2, :]


# ---------------------------------------------------------------------------
# Wrapper
# ---------------------------------------------------------------------------
def post_low_energy_v2(src, src_mask, variance_adaptor_output, spkr_emb, params):
    del src_mask  # consumed only by the (identity) encoder

    x_cat = jnp.concatenate(
        [src.reshape(B * T, VOCAB),
         variance_adaptor_output.reshape(B * T, D_MODEL)], axis=-1)   # (B*T, 64)

    outputs2, embed_ind, diff = pl.pallas_call(
        _fused_kernel,
        out_shape=(
            jax.ShapeDtypeStruct((B * T, OUT_SIZE), jnp.float32),
            jax.ShapeDtypeStruct((B,), jnp.int32),
            jax.ShapeDtypeStruct((1,), jnp.float32),
        ),
        in_specs=[pl.BlockSpec(memory_space=pltpu.MemorySpace.VMEM)] * 4,
        out_specs=(
            pl.BlockSpec(memory_space=pltpu.MemorySpace.VMEM),
            pl.BlockSpec(memory_space=pltpu.MemorySpace.SMEM),
            pl.BlockSpec(memory_space=pltpu.MemorySpace.SMEM),
        ),
    )(x_cat, spkr_emb, params["blob_a"], params["blob_b"])

    outputs = outputs2.reshape(B, T, OUT_SIZE)
    intermediate_outs = None                 # intermediate_layers_out is None
    return outputs, intermediate_outs, diff[0], embed_ind


def init_params(key):
    ks = jax.random.split(key, 11)
    s = 0.1
    # PyTorch weights are (out, in); fold / transpose / pack once here.
    w1 = jax.random.normal(ks[0], (D_MODEL, VOCAB), jnp.float32) * s    # linear1
    b1 = jax.random.normal(ks[1], (D_MODEL,), jnp.float32) * s
    w2 = jax.random.normal(ks[2], (D_MODEL, D_MODEL), jnp.float32) * s  # linear2
    b2 = jax.random.normal(ks[3], (D_MODEL,), jnp.float32) * s
    wx = jax.random.normal(ks[4], (D_MODEL, SPK_DIM), jnp.float32) * s  # linear_xvector
    bx = jax.random.normal(ks[5], (D_MODEL,), jnp.float32) * s
    wvq = jax.random.normal(ks[6], (D_MODEL, VOCAB), jnp.float32) * s   # vq_encoder_lmfb (1x1 conv)
    bvq = jax.random.normal(ks[7], (D_MODEL,), jnp.float32) * s
    embed = jax.random.normal(ks[8], (D_MODEL, N_EMBED), jnp.float32)   # Quantize.embed
    wo = jax.random.normal(ks[9], (OUT_SIZE, D_MODEL), jnp.float32) * s  # out
    bo = jax.random.normal(ks[10], (OUT_SIZE,), jnp.float32) * s

    # Algebraic fold through the identity encoder (exact under that assumption).
    wo_t = wo.T                                            # (D, OUT)
    bsum = (b1 + b2 + bx).reshape(1, -1)                   # (1, D)
    w_fold_main = jnp.concatenate([w1.T @ wo_t, w2.T @ wo_t], axis=0)   # (V+D, OUT)
    wxo = wx.T @ wo_t                                      # (S, OUT)
    bo_fold = bsum @ wo_t + bo.reshape(1, -1)              # (1, OUT)
    blob_a = jnp.concatenate([w_fold_main, wxo, wo_t, bo_fold], axis=0)  # (113, OUT)
    assert blob_a.shape == (A_ROWS, OUT_SIZE)

    # VQ blob: [Wvq^T ; 0] so the concatenated vao lanes contribute nothing;
    # codebook padded to NPAD codes, padded codes pushed out of the argmin.
    wvq_full = jnp.concatenate([wvq.T, jnp.zeros((D_MODEL, D_MODEL), jnp.float32)], axis=0)
    bvq_row = bvq.reshape(1, -1)
    embed_pad = jnp.pad(embed, ((0, 0), (0, NPAD - N_EMBED)))              # (D, NPAD)
    e_sq = jnp.sum(embed * embed, axis=0, keepdims=True)                   # (1, N_EMBED)
    e_sq_pad = jnp.pad(e_sq, ((0, 0), (0, NPAD - N_EMBED)), constant_values=1e30)
    embed_t_pad = jnp.pad(embed.T, ((0, NPAD - N_EMBED), (0, 0)))          # (NPAD, D)
    pad7 = jnp.zeros((7, D_MODEL), jnp.float32)
    blob_b = jnp.concatenate(
        [wvq_full, bvq_row, pad7, embed_pad, e_sq_pad, pad7, embed_t_pad], axis=0)
    assert blob_b.shape == (B_ROWS, D_MODEL)

    return dict(blob_a=blob_a, blob_b=blob_b)


if __name__ == "__main__":
    key = jax.random.PRNGKey(0)
    k1, k2, k3, kp = jax.random.split(key, 4)
    src = jax.random.normal(k1, (B, T, VOCAB), jnp.float32)
    variance_adaptor_output = jax.random.normal(k2, (B, T, D_MODEL), jnp.float32)
    spkr_emb = jax.random.normal(k3, (B, SPK_DIM), jnp.float32)
    src_mask = jnp.ones((B, 1, T), jnp.bool_)

    params = init_params(kp)
    outputs, intermediate_outs, diff, embed_ind = post_low_energy_v2(
        src, src_mask, variance_adaptor_output, spkr_emb, params)

    jax.block_until_ready(outputs)
    jax.block_until_ready(diff)
    jax.block_until_ready(embed_ind)
    assert outputs.shape == (B, T, OUT_SIZE)
    assert outputs.dtype == jnp.float32
    assert diff.shape == ()
    assert embed_ind.shape == (B,)
    assert int(jnp.max(embed_ind)) < N_EMBED and int(jnp.min(embed_ind)) >= 0
    print("KERNEL_OK")
</pallas_src>

<mosaic_0001>
module attributes {stable_mosaic.version = 11 : i64} {
  func.func @_fused_kernel(%arg0: memref<16x64xf32, #tpu.memory_space<vmem>>, %arg1: memref<2x16xf32, #tpu.memory_space<vmem>>, %arg2: memref<113x16xf32, #tpu.memory_space<vmem>>, %arg3: memref<144x32xf32, #tpu.memory_space<vmem>>, %arg4: memref<16x16xf32, #tpu.memory_space<vmem>>, %arg5: memref<2xi32, #tpu.memory_space<smem>>, %arg6: memref<1xf32, #tpu.memory_space<smem>>) attributes {dimension_semantics = [], scalar_prefetch = 0 : i64, scratch_operands = 0 : i64, tpu.core_type = #tpu.core_type<tc>} {
    %c0 = arith.constant 0 : index
    %c0_0 = arith.constant 0 : index
    %0 = vector.load %arg0[%c0, %c0_0] : memref<16x64xf32, #tpu.memory_space<vmem>>, vector<16x64xf32>
    %c0_1 = arith.constant 0 : index
    %c0_2 = arith.constant 0 : index
    %1 = vector.load %arg1[%c0_1, %c0_2] : memref<2x16xf32, #tpu.memory_space<vmem>>, vector<2x16xf32>
    %2 = vector.extract_strided_slice %0 {offsets = [0, 0], sizes = [8, 64], strides = [1, 1]} : vector<16x64xf32> to vector<8x64xf32>
    %cst = arith.constant dense<0.000000e+00> : vector<64xf32>
    %3 = vector.multi_reduction <add>, %2, %cst [0] : vector<8x64xf32> to vector<64xf32>
    %4 = vector.shape_cast %3 : vector<64xf32> to vector<1x64xf32>
    %5 = vector.extract_strided_slice %0 {offsets = [8, 0], sizes = [8, 64], strides = [1, 1]} : vector<16x64xf32> to vector<8x64xf32>
    %cst_3 = arith.constant dense<0.000000e+00> : vector<64xf32>
    %6 = vector.multi_reduction <add>, %5, %cst_3 [0] : vector<8x64xf32> to vector<64xf32>
    %7 = vector.shape_cast %6 : vector<64xf32> to vector<1x64xf32>
    %8 = tpu.concatenate %4, %7 in 0 : vector<1x64xf32>, vector<1x64xf32> -> vector<2x64xf32>
    %cst_4 = arith.constant 1.250000e-01 : f32
    %9 = vector.broadcast %cst_4 : f32 to vector<2x64xf32>
    %10 = arith.mulf %8, %9 : vector<2x64xf32>
    %c0_5 = arith.constant 0 : index
    %c0_6 = arith.constant 0 : index
    %11 = vector.load %arg3[%c0_5, %c0_6] : memref<144x32xf32, #tpu.memory_space<vmem>>, vector<64x32xf32>
    %cst_7 = arith.constant dense<0.000000e+00> : vector<2x32xf32>
    %12 = tpu.matmul %10, %11, %cst_7 {dimension_numbers = #tpu.dot_dimension_numbers<[1], [0], [0], [1], [0, 0, 1, 1], [], []>} : vector<2x64xf32>, vector<64x32xf32>, vector<2x32xf32> -> vector<2x32xf32>
    %c64 = arith.constant 64 : index
    %c0_8 = arith.constant 0 : index
    %13 = vector.load %arg3[%c64, %c0_8] : memref<144x32xf32, #tpu.memory_space<vmem>>, vector<1x32xf32>
    %14 = vector.broadcast %13 : vector<1x32xf32> to vector<2x32xf32>
    %15 = arith.addf %12, %14 : vector<2x32xf32>
    %c72 = arith.constant 72 : index
    %c0_9 = arith.constant 0 : index
    %16 = vector.load %arg3[%c72, %c0_9] : memref<144x32xf32, #tpu.memory_space<vmem>>, vector<32x32xf32>
    %cst_10 = arith.constant dense<0.000000e+00> : vector<2x32xf32>
    %17 = tpu.matmul %15, %16, %cst_10 {dimension_numbers = #tpu.dot_dimension_numbers<[1], [0], [0], [1], [0, 0, 1, 1], [], []>} : vector<2x32xf32>, vector<32x32xf32>, vector<2x32xf32> -> vector<2x32xf32>
    %cst_11 = arith.constant -2.000000e+00 : f32
    %18 = vector.broadcast %cst_11 : f32 to vector<2x32xf32>
    %19 = arith.mulf %18, %17 : vector<2x32xf32>
    %c104 = arith.constant 104 : index
    %c0_12 = arith.constant 0 : index
    %20 = vector.load %arg3[%c104, %c0_12] : memref<144x32xf32, #tpu.memory_space<vmem>>, vector<1x32xf32>
    %21 = vector.broadcast %20 : vector<1x32xf32> to vector<2x32xf32>
    %22 = arith.addf %19, %21 : vector<2x32xf32>
    %23 = tpu.iota {dimensions = array<i32: 1>} : vector<2x32xi32>
    %24 = tpu.iota {dimensions = array<i32: 0>} : vector<2x32xi32>
    %cst_13 = arith.constant dense<0x7F800000> : vector<2xf32>
    %25 = vector.multi_reduction <minimumf>, %22, %cst_13 [1] : vector<2x32xf32> to vector<2xf32>
    %26 = vector.shape_cast %25 : vector<2xf32> to vector<2x1xf32>
    %27 = vector.broadcast %26 : vector<2x1xf32> to vector<2x32xf32>
    %28 = arith.cmpf oeq, %22, %27 : vector<2x32xf32>
    %c32_i32 = arith.constant 32 : i32
    %29 = vector.broadcast %c32_i32 : i32 to vector<2x32xi32>
    %30 = arith.select %28, %23, %29 : vector<2x32xi1>, vector<2x32xi32>
    %cst_14 = arith.constant dense<2147483647> : vector<2xi32>
    %31 = vector.multi_reduction <minsi>, %30, %cst_14 [1] : vector<2x32xi32> to vector<2xi32>
    %32 = vector.shape_cast %31 : vector<2xi32> to vector<2x1xi32>
    %33 = vector.broadcast %32 : vector<2x1xi32> to vector<2x32xi32>
    %34 = arith.cmpi eq, %23, %33 : vector<2x32xi32>
    %35 = arith.extui %34 : vector<2x32xi1> to vector<2x32xi32>
    %36 = arith.sitofp %35 : vector<2x32xi32> to vector<2x32xf32>
    %c112 = arith.constant 112 : index
    %c0_15 = arith.constant 0 : index
    %37 = vector.load %arg3[%c112, %c0_15] : memref<144x32xf32, #tpu.memory_space<vmem>>, vector<32x32xf32>
    %cst_16 = arith.constant dense<0.000000e+00> : vector<2x32xf32>
    %38 = tpu.matmul %36, %37, %cst_16 {dimension_numbers = #tpu.dot_dimension_numbers<[1], [0], [0], [1], [0, 0, 1, 1], [], []>} : vector<2x32xf32>, vector<32x32xf32>, vector<2x32xf32> -> vector<2x32xf32>
    %39 = arith.subf %38, %15 : vector<2x32xf32>
    %40 = arith.mulf %39, %39 : vector<2x32xf32>
    %41 = vector.shape_cast %40 : vector<2x32xf32> to vector<1x2x32xf32>
    %cst_17 = arith.constant dense<0.000000e+00> : vector<1xf32>
    %42 = vector.multi_reduction <add>, %41, %cst_17 [1, 2] : vector<1x2x32xf32> to vector<1xf32>
    %43 = vector.shape_cast %42 : vector<1xf32> to vector<1x1x1xf32>
    %44 = vector.extract %43[0, 0, 0] : f32 from vector<1x1x1xf32>
    %cst_18 = arith.constant 1.562500e-02 : f32
    %45 = arith.mulf %44, %cst_18 : f32
    %c0_19 = arith.constant 0 : index
    %46 = memref.load %arg6[%c0_19] : memref<1xf32, #tpu.memory_space<smem>>
    memref.store %45, %arg6[%c0_19] : memref<1xf32, #tpu.memory_space<smem>>
    %c0_i32 = arith.constant 0 : i32
    %47 = vector.broadcast %c0_i32 : i32 to vector<2x32xi32>
    %48 = arith.cmpi eq, %24, %47 : vector<2x32xi32>
    %49 = arith.andi %28, %48 : vector<2x32xi1>
    %c32_i32_20 = arith.constant 32 : i32
    %50 = vector.broadcast %c32_i32_20 : i32 to vector<2x32xi32>
    %51 = arith.select %49, %23, %50 : vector<2x32xi1>, vector<2x32xi32>
    %52 = vector.shape_cast %51 : vector<2x32xi32> to vector<1x2x32xi32>
    %cst_21 = arith.constant dense<2147483647> : vector<1xi32>
    %53 = vector.multi_reduction <minsi>, %52, %cst_21 [1, 2] : vector<1x2x32xi32> to vector<1xi32>
    %54 = vector.shape_cast %53 : vector<1xi32> to vector<1x1x1xi32>
    %55 = vector.extract %54[0, 0, 0] : i32 from vector<1x1x1xi32>
    %c0_22 = arith.constant 0 : index
    %56 = memref.load %arg5[%c0_22] : memref<2xi32, #tpu.memory_space<smem>>
    memref.store %55, %arg5[%c0_22] : memref<2xi32, #tpu.memory_space<smem>>
    %c1_i32 = arith.constant 1 : i32
    %57 = vector.broadcast %c1_i32 : i32 to vector<2x32xi32>
    %58 = arith.cmpi eq, %24, %57 : vector<2x32xi32>
    %59 = arith.andi %28, %58 : vector<2x32xi1>
    %c32_i32_23 = arith.constant 32 : i32
    %60 = vector.broadcast %c32_i32_23 : i32 to vector<2x32xi32>
    %61 = arith.select %59, %23, %60 : vector<2x32xi1>, vector<2x32xi32>
    %62 = vector.shape_cast %61 : vector<2x32xi32> to vector<1x2x32xi32>
    %cst_24 = arith.constant dense<2147483647> : vector<1xi32>
    %63 = vector.multi_reduction <minsi>, %62, %cst_24 [1, 2] : vector<1x2x32xi32> to vector<1xi32>
    %64 = vector.shape_cast %63 : vector<1xi32> to vector<1x1x1xi32>
    %65 = vector.extract %64[0, 0, 0] : i32 from vector<1x1x1xi32>
    %c1 = arith.constant 1 : index
    %66 = memref.load %arg5[%c1] : memref<2xi32, #tpu.memory_space<smem>>
    memref.store %65, %arg5[%c1] : memref<2xi32, #tpu.memory_space<smem>>
    %c0_25 = arith.constant 0 : index
    %c0_26 = arith.constant 0 : index
    %67 = vector.load %arg2[%c0_25, %c0_26] : memref<113x16xf32, #tpu.memory_space<vmem>>, vector<64x16xf32>
    %cst_27 = arith.constant dense<0.000000e+00> : vector<16x16xf32>
    %68 = tpu.matmul %0, %67, %cst_27 {dimension_numbers = #tpu.dot_dimension_numbers<[1], [0], [0], [1], [0, 0, 1, 1], [], []>} : vector<16x64xf32>, vector<64x16xf32>, vector<16x16xf32> -> vector<16x16xf32>
    %c64_28 = arith.constant 64 : index
    %c0_29 = arith.constant 0 : index
    %69 = vector.load %arg2[%c64_28, %c0_29] : memref<113x16xf32, #tpu.memory_space<vmem>>, vector<16x16xf32>
    %cst_30 = arith.constant dense<0.000000e+00> : vector<2x16xf32>
    %70 = tpu.matmul %1, %69, %cst_30 {dimension_numbers = #tpu.dot_dimension_numbers<[1], [0], [0], [1], [0, 0, 1, 1], [], []>} : vector<2x16xf32>, vector<16x16xf32>, vector<2x16xf32> -> vector<2x16xf32>
    %c80 = arith.constant 80 : index
    %c0_31 = arith.constant 0 : index
    %71 = vector.load %arg2[%c80, %c0_31] : memref<113x16xf32, #tpu.memory_space<vmem>>, vector<32x16xf32>
    %cst_32 = arith.constant dense<0.000000e+00> : vector<2x16xf32>
    %72 = tpu.matmul %38, %71, %cst_32 {dimension_numbers = #tpu.dot_dimension_numbers<[1], [0], [0], [1], [0, 0, 1, 1], [], []>} : vector<2x32xf32>, vector<32x16xf32>, vector<2x16xf32> -> vector<2x16xf32>
    %73 = arith.addf %70, %72 : vector<2x16xf32>
    %c112_33 = arith.constant 112 : index
    %c0_34 = arith.constant 0 : index
    %74 = vector.load %arg2[%c112_33, %c0_34] : memref<113x16xf32, #tpu.memory_space<vmem>>, vector<1x16xf32>
    %75 = vector.broadcast %74 : vector<1x16xf32> to vector<2x16xf32>
    %76 = arith.addf %73, %75 : vector<2x16xf32>
    %77 = vector.extract_strided_slice %68 {offsets = [0, 0], sizes = [8, 16], strides = [1, 1]} : vector<16x16xf32> to vector<8x16xf32>
    %78 = vector.extract_strided_slice %76 {offsets = [0, 0], sizes = [1, 16], strides = [1, 1]} : vector<2x16xf32> to vector<1x16xf32>
    %79 = vector.broadcast %78 : vector<1x16xf32> to vector<8x16xf32>
    %80 = arith.addf %77, %79 : vector<8x16xf32>
    %c0_35 = arith.constant 0 : index
    %c0_36 = arith.constant 0 : index
    %81 = vector.load %arg4[%c0_35, %c0_36] : memref<16x16xf32, #tpu.memory_space<vmem>>, vector<8x16xf32>
    tpu.vector_store %arg4[%c0_35, %c0_36], %80 {strides = array<i32>} : memref<16x16xf32, #tpu.memory_space<vmem>>, vector<8x16xf32>,
    %82 = vector.extract_strided_slice %68 {offsets = [8, 0], sizes = [8, 16], strides = [1, 1]} : vector<16x16xf32> to vector<8x16xf32>
    %83 = vector.extract_strided_slice %76 {offsets = [1, 0], sizes = [1, 16], strides = [1, 1]} : vector<2x16xf32> to vector<1x16xf32>
    %84 = vector.broadcast %83 : vector<1x16xf32> to vector<8x16xf32>
    %85 = arith.addf %82, %84 : vector<8x16xf32>
    %c8 = arith.constant 8 : index
    %c0_37 = arith.constant 0 : index
    %86 = vector.load %arg4[%c8, %c0_37] : memref<16x16xf32, #tpu.memory_space<vmem>>, vector<8x16xf32>
    tpu.vector_store %arg4[%c8, %c0_37], %85 {strides = array<i32>} : memref<16x16xf32, #tpu.memory_space<vmem>>, vector<8x16xf32>,
    return
  }
}

</mosaic_0001>

<bundles_post_ra>
// kernel: tpu_custom_call.1
= control target key start
LH: loop header
LB: loop body
LE: loop exit
PB: predicated region body
PF: predicated region fallthrough
CT: control target
= control target key end

     0   :  { %12 = vsyncpa [#allocation3], 0  ;;  %s1189_s0 = inlined_call_operand.vmem [shape: f32[16,64], index: 0, kind: input, shape index: {}]   ;;  %s1190_s1 = inlined_call_operand.vmem [shape: f32[2,16], index: 1, kind: input, shape index: {}]   ;;  %s1191_s2 = inlined_call_operand.vmem [shape: f32[113,16], index: 2, kind: input, shape index: {}]   ;;  %s1192_s3 = inlined_call_operand.vmem [shape: f32[144,32], index: 3, kind: input, shape index: {}]   ;;  %s1193_s4 = inlined_call_operand.hbm [shape: f32[16,16], index: 4, kind: output, shape index: {0}]   ;;  %s1194_s5 = inlined_call_operand.hbm [shape: s32[2], index: 5, kind: output, shape index: {1}]   ;;  %s1195_s6 = inlined_call_operand.hbm [shape: f32[1], index: 6, kind: output, shape index: {2}]  }
   0x1   :  { %13 = vsyncpa [#allocation4], 0  ;;  %v44_v0 = vld [vmem:[%s1192_s3] sm:$0xff]  ;;  %v45_v1 = vld [vmem:[%s1192_s3 + $0x8] sm:$0xff]  ;;  %v933_v3 = vmov 0.0|0.0   ;;  %vm934_vm0 = vmmov 0  }
   0x2   :  { %v46_v2 = vld [vmem:[%s1192_s3 + $0x10] sm:$0xff]  ;;  %822 = vmatprep.subr.bf16.mxu0 %v933_v3  ;;  %v823_v4 = vpack.c.bf16 %v45_v1, %v44_v0  ;;  %v47_v5 = vld [vmem:[%s1192_s3 + $0x18] sm:$0xff]  ;;  %v935_v6 = vmov 0.0   ;;  %vm26_vm1 = vcmask 523264   ;;  %v23_v7 = vld [vmem:[%s1189_s0] sm:$0xff]  ;;  %834 = vmatprep.subr.bf16.mxu1 %v933_v3 }
   0x3   :  { %760 = vmatprep.mubr.msk.f32.mxu0 %vm934_vm0, %v935_v6  ;;  %771 = vmatprep.mubr.msk.f32.mxu1 %vm934_vm0, %v935_v6  ;;  %v826_v8 = vpack.c.bf16 %v47_v5, %v46_v2  ;;  %v1000_v9 = vld [vmem:[%s1189_s0 + $0x8] sm:$0xff]  ;;  %v27_v10 = vsel %vm26_vm1, %v23_v7, 0.0  ;;  %v131_v12 = vld [vmem:[%s1192_s3 + $0x50] sm:$0xff]  ;;  %v48_v13 = vld [vmem:[%s1192_s3 + $0x20] sm:$0xff] }
   0x4   :  { %824 = vmatpush3.bf16.msra.mxu0 %v823_v4  ;;  %v130_v11 = vld [vmem:[%s1192_s3 + $0x48] sm:$0xff]  ;;  %v28_v15 = vrot.slane %v27_v10, 4  ;;  %v34_v16 = vsel %vm26_vm1, %v1000_v9, 0.0 }
   0x5   :  { %825 = vmatprep.subr.bf16.mxu0 %v933_v3  ;;  %v49_v14 = vld [vmem:[%s1192_s3 + $0x28] sm:$0xff]  ;;  %v835_v17 = vpack.c.bf16 %v131_v12, %v130_v11 }
   0x6   :  { %14 = vsyncpa [#allocation7], 0  ;;  %v35_v18 = vrot.slane %v34_v16, 4  ;;  %v29_v19 = vadd.f32 %v28_v15, %v27_v10  ;;  %v829_v20 = vpack.c.bf16 %v49_v14, %v48_v13  ;;  %v50_v22 = vld [vmem:[%s1192_s3 + $0x30] sm:$0xff]  ;;  %v51_v23 = vld [vmem:[%s1192_s3 + $0x38] sm:$0xff]  ;;  %vm41_vm2 = vcmask 1040384  }
   0x7   :  { %836 = vmatpush3.bf16.msra.mxu1 %v835_v17  ;;  %v832_v27 = vpack.c.bf16 %v51_v23, %v50_v22  ;;  %v132_v35 = vld [vmem:[%s1192_s3 + $0x58] sm:$0xff]  ;;  %v133_v36 = vld [vmem:[%s1192_s3 + $0x60] sm:$0xff]  ;;  %vm134_vm3 = vcmask 261120   ;;  %v699_v43 = vld [vmem:[%s1192_s3 + $0x68] ss:$0 sm:$0xff]  ;;  %vm219_vm4 = vcmask 254976   ;;  %v215_v48 = vlaneseq }
   0x8   :  { %827 = vmatpush3.bf16.msra.mxu0 %v826_v8  ;;  %v36_v21 = vadd.f32 %v35_v18, %v34_v16  ;;  %837 = vmatprep.subr.bf16.mxu1 %v933_v3  ;;  %v30_v24 = vrot.slane %v29_v19, 2  ;;  %v838_v37 = vpack.c.bf16 %v133_v36, %v132_v35  ;;  %v696_v38 = vld [vmem:[%s1192_s3 + $0x40] ss:$0 sm:$0xff]  ;;  %v243_v60 = vld [vmem:[%s1192_s3 + $0x70] sm:$0xff]  ;;  %v244_v61 = vld [vmem:[%s1192_s3 + $0x78] sm:$0xff]  ;;  %vm563_vm14 = vcmask 130048  }
   0x9   :  { %828 = vmatprep.subr.bf16.mxu0 %v933_v3  ;;  %v1049_v49 = vshrl.u32 %v215_v48, 7  ;;  %v216_v50 = vand.u32 127, %v215_v48  ;;  %v841_v62 = vpack.c.bf16 %v244_v61, %v243_v60  ;;  %v245_v14 = vld [vmem:[%s1192_s3 + $0x80] sm:$0xff]  ;;  %v246_v15 = vld [vmem:[%s1192_s3 + $0x88] sm:$0xff]  ;;  %s885_s19 = scalar_lea.hbm %s1194_s5, 16 }
   0xa   :  { %v37_v25 = vrot.slane %v36_v21, 2  ;;  %v31_v26 = vadd.f32 %v30_v24, %v29_v19  ;;  %v844_v16 = vpack.c.bf16 %v246_v15, %v245_v14  ;;  %v488_v36 = vld [vmem:[%s1191_s2 + $0x60] sm:$0xff]  ;;  %p886_p0 = scmp.ne.s32.totalorder %s1194_s5, %s885_s19  ;;  %p889_p1 = scmp.lt.u32.totalorder %s885_s19, %s1194_s5 }
   0xb   :  { %839 = vmatpush3.bf16.msra.mxu1 %v838_v37  ;;  %vm365_vm5 = vcmp.eq.s32.totalorder %v1049_v49, 1  ;;  %vm335_vm8 = vcmp.eq.s32.totalorder %v1049_v49, 0  ;;  %v489_v37 = vld [vmem:[%s1191_s2 + $0x68] sm:$0xff] }
   0xc   :  { %830 = vmatpush3.bf16.msra.mxu0 %v829_v20  ;;  %v38_v28 = vadd.f32 %v37_v25, %v36_v21  ;;  %v32_v29 = vrot.slane %v31_v26, 1  ;;  %840 = vmatprep.subr.bf16.mxu1 %v933_v3  ;;  %p891_p2 = pnand %p889_p1, %p886_p0 }
   0xd   :  { %831 = vmatprep.subr.bf16.mxu0 %v933_v3 }
   0xe   :  { %v39_v30 = vrot.slane %v38_v28, 1  ;;  %v33_v31 = vadd.f32 %v32_v29, %v31_v26  ;;  %v486_v29 = vld [vmem:[%s1191_s2 + $0x50] sm:$0xff] }
  0x10   :  { %833 = vmatpush3.bf16.msra.mxu0 %v832_v27  ;;  %v40_v32 = vadd.f32 %v39_v30, %v38_v28  ;;  %v395_v27 = vld [vmem:[%s1191_s2] sm:$0xff]  ;;  %v396_v28 = vld [vmem:[%s1191_s2 + $0x8] sm:$0xff] }
  0x11   :  { %v846_v30 = vpack.c.bf16 %v396_v28, %v395_v27 }
  0x12   :  { %v42_v33 = vsel %vm41_vm2, %v33_v31, %v40_v32  ;;  %v487_v31 = vld [vmem:[%s1191_s2 + $0x58] sm:$0xff]  ;;  %v397_v32 = vld [vmem:[%s1191_s2 + $0x10] sm:$0xff] }
  0x13   :  { %v43_v34 = vmul.f32 0.125, %v42_v33  ;;  %v398_v33 = vld [vmem:[%s1191_s2 + $0x18] sm:$0xff]  ;;  %847 = vmatprep.subr.bf16.mxu0 %v846_v30 }
  0x14   :  { %v850_v35 = vpack.c.bf16 %v398_v33, %v397_v32 }
  0x15   :  { %761 = vmatmul.mubr.msk.f32.vlgmr.msra.gmra.mrb[0].mxu0 %vm26_vm1, %v43_v34  ;;  %v863_v34 = vpack.c.bf16 %v487_v31, %v486_v29 }
  0x16   :  { %801 = vmatprep.mubr.msk.f32.mxu0 %vm26_vm1, %v23_v7  ;;  %849 = vmatpush3.bf16.msra.mxu0 %v846_v30 }
  0x17   :  { %851 = vmatprep.subr.bf16.mxu0 %v850_v35 }
  0x1a   :  { %853 = vmatpush3.bf16.msra.mxu0 %v850_v35 }
  0xe8   :  { %v126_v39 = vpop.f32.mrb[0].mxu0 }
  0xe9   :  { %v1039_v40 = vadd.f32 %v696_v38, %v126_v39  ;;  %v762_v41 = vpop.f32.mrb[1].mxu0  ;;  %v866_v38 = vpack.c.bf16 %v489_v37, %v488_v36  ;;  %v399_v39 = vld [vmem:[%s1191_s2 + $0x20] sm:$0xff] }
  0xea   :  { %v400_v41 = vld [vmem:[%s1191_s2 + $0x28] sm:$0xff] }
  0xeb   :  { %772 = vmatmul.mubr.msk.f32.vlgmr.msra.gmra.mrb[0].mxu1 %vm134_vm3, %v1039_v40 }
  0xec   :  { %782 = vmatprep.mubr.msk.f32.mxu1 %vm934_vm0, %v935_v6  ;;  %842 = vmatpush3.bf16.msra.mxu1 %v841_v62 }
  0xed   :  { %843 = vmatprep.subr.bf16.mxu1 %v933_v3 }
  0xf0   :  { %845 = vmatpush3.bf16.msra.mxu1 %v844_v16 }
  0xf1   :  { %862 = vmatprep.subr.bf16.mxu1 %v933_v3 }
 0x1be   :  { %v204_v42 = vpop.f32.mrb[0].mxu1 }
 0x1bf   :  { %v208_v44 = vmul.f32 -2.0, %v204_v42  ;;  %v773_v45 = vpop.f32.mrb[1].mxu1  ;;  %v854_v42 = vpack.c.bf16 %v400_v41, %v399_v39 }
 0x1c0   :  { %v484_v45 = vld [vmem:[%s1191_s2 + $0x40] sm:$0xff] }
 0x1c1   :  { %v214_v46 = vadd.f32 %v699_v43, %v208_v44  ;;  %855 = vmatprep.subr.bf16.mxu0 %v854_v42  ;;  %v401_v43 = vld [vmem:[%s1191_s2 + $0x30] sm:$0xff]  ;;  %v402_v44 = vld [vmem:[%s1191_s2 + $0x38] sm:$0xff] }
 0x1c2   :  { %857 = vmatpush3.bf16.msra.mxu0 %v854_v42 }
 0x1c3   :  { %v220_v47 = vsel %vm219_vm4, %v214_v46, inf }
 0x1c4   :  { %221 = vmin.xlane.f32.xlu0 %v220_v47 }
 0x251   :  { %v222_v51 = vpop.xlane.xlu0 %221 }
 0x252   :  { %vm223_vm6 = vcmp.eq.f32.partialorder %v214_v46, %v222_v51  ;;  %v485_v46 = vld [vmem:[%s1191_s2 + $0x48] sm:$0xff] }
 0x253   :  { %v224_v52 = vsel %vm223_vm6, %v216_v50, 32  ;;  %vm366_vm7 = vmand %vm223_vm6, %vm365_vm5  ;;  %v869_v47 = vpack.c.bf16 %v485_v46, %v484_v45 }
 0x254   :  { %v225_v53 = vsel %vm219_vm4, %v224_v52, 2147483647  ;;  %v367_v54 = vsel %vm366_vm7, %v216_v50, 32  ;;  %vm336_vm9 = vmand %vm223_vm6, %vm335_vm8 }
 0x255   :  { %v227_v55 = vshra.s32 %v225_v53, 16  ;;  %v368_v56 = vsel %vm219_vm4, %v367_v54, 2147483647  ;;  %v337_v63 = vsel %vm336_vm9, %v216_v50, 32  ;;  %v226_v0 = vand.u32 65535, %v225_v53 }
 0x256   :  { %v370_v58 = vshra.s32 %v368_v56, 16  ;;  %v338_v1 = vsel %vm219_vm4, %v337_v63, 2147483647  ;;  %v369_v5 = vand.u32 65535, %v368_v56 }
 0x257   :  { %v229_v57 = vcvt.s32.f32 %v227_v55  ;;  %v228_v4 = vcvt.s32.f32 %v226_v0  ;;  %v340_v7 = vshra.s32 %v338_v1, 16  ;;  %v339_v19 = vand.u32 65535, %v338_v1 }
 0x258   :  { %v372_v59 = vcvt.s32.f32 %v370_v58  ;;  %v371_v11 = vcvt.s32.f32 %v369_v5 }
 0x259   :  { %230 = vmin.xlane.f32.xlu0 %v229_v57  ;;  %v342_v12 = vcvt.s32.f32 %v340_v7  ;;  %v341_v24 = vcvt.s32.f32 %v339_v19 }
 0x25d   :  { %373 = vmin.xlane.f32.xlu0 %v372_v59 }
 0x2e6   :  { %v231_v2 = vpop.xlane.xlu0 %230 }
 0x2e7   :  { %vm232_vm10 = vcmp.eq.f32.partialorder %v229_v57, %v231_v2  ;;  %v237_v17 = vcvt.f32.s32 %v231_v2 }
 0x2e8   :  { %v233_v8 = vsel %vm232_vm10, %v228_v4, inf }
 0x2e9   :  { %234 = vmin.xlane.f32.xlu1 %v233_v8  ;;  %v238_v20 = vshll.u32 %v237_v17, 16 }
 0x2ea   :  { %v1066_v10 = vpop.xlane.xlu0 %373 }
 0x2eb   :  { %vm375_vm11 = vcmp.eq.f32.partialorder %v372_v59, %v1066_v10 }
 0x2ec   :  { %v376_v13 = vsel %vm375_vm11, %v371_v11, inf }
 0x2ed   :  { %377 = vmin.xlane.f32.xlu0 %v376_v13  ;;  %343 = vmin.xlane.f32.xlu1 %v342_v12 }
 0x376   :  { %v235_v18 = vpop.xlane.xlu1 %234 }
 0x377   :  { %v236_v21 = vcvt.f32.s32 %v235_v18 }
 0x379   :  { %v239_v22 = vadd.s32 %v238_v20, %v236_v21 }
 0x37a   :  { %v1076_v23 = vpop.xlane.xlu1 %343  ;;  %v378_v56 = vpop.xlane.xlu0 %377 }
 0x37b   :  { %vm240_vm12 = vcmp.eq.s32.totalorder %v216_v50, %v239_v22  ;;  %vm345_vm13 = vcmp.eq.f32.partialorder %v342_v12, %v1076_v23  ;;  %v350_v57 = vcvt.f32.s32 %v1076_v23  ;;  %v379_v59 = vcvt.f32.s32 %v378_v56 }
 0x37c   :  { %v700_v25 = vsel %vm240_vm12, 1.0, %v935_v6  ;;  %v346_v26 = vsel %vm345_vm13, %v341_v24, inf }
 0x37d   :  { %783 = vmatmul.mubr.msk.f32.vlgmr.msra.gmra.mrb[2].mxu1 %vm134_vm3, %v700_v25  ;;  %347 = vmin.xlane.f32.xlu1 %v346_v26  ;;  %v351_v60 = vshll.u32 %v350_v57, 16 }
 0x37e   :  { %812 = vmatprep.mubr.msk.f32.mxu1 %vm934_vm0, %v935_v6  ;;  %864 = vmatpush3.bf16.msra.mxu1 %v863_v34 }
 0x37f   :  { %865 = vmatprep.subr.bf16.mxu1 %v933_v3 }
 0x382   :  { %867 = vmatpush3.bf16.msra.mxu1 %v866_v38 }
 0x383   :  { %868 = vmatprep.subr.bf16.mxu1 %v933_v3  ;;  %v858_v3 = vpack.c.bf16 %v402_v44, %v401_v43 }
 0x385   :  { %859 = vmatprep.subr.bf16.mxu0 %v858_v3 }
 0x386   :  { %861 = vmatpush3.bf16.msra.mxu0 %v858_v3 }
 0x389   :  { %802 = vmatmul.mubr.msk.f32.vlgmr.msra.gmra.mrb[2].mxu0 %vm26_vm1, %v1000_v9  ;;  %v25_v9 = vld [vmem:[%s1190_s1] sm:$0x3] }
 0x40a   :  { %v348_v55 = vpop.xlane.xlu1 %347 }
 0x40b   :  { %v349_v58 = vcvt.f32.s32 %v348_v55 }
 0x40d   :  { %v352_v62 = vadd.s32 %v351_v60, %v349_v58 }
 0x40f   :  { %v353_v0 = vrot.slane %v352_v62, 4 }
 0x411   :  { %vm354_vm15 = vcmp.lt.s32.totalorder %v352_v62, %v353_v0 }
 0x412   :  { %v355_v2 = vsel %vm354_vm15, %v352_v62, %v353_v0 }
 0x413   :  { %v356_v5 = vrot.slane %v355_v2, 2 }
 0x415   :  { %vm357_vm1 = vcmp.lt.s32.totalorder %v355_v2, %v356_v5 }
 0x450   :  { %v316_v48 = vpop.f32.mrb[2].mxu1 }
 0x451   :  { %v320_v50 = vsub.f32 %v316_v48, %v1039_v40  ;;  %v784_v51 = vpop.f32.mrb[3].mxu1  ;;  %813 = vmatmul.mubr.msk.f32.vlgmr.msra.gmra.mrb[4].mxu1 %vm134_vm3, %v316_v48 }
 0x452   :  { %870 = vmatpush3.bf16.msra.mxu1 %v869_v47  ;;  %819 = vmatprep.mubr.msk.f32.mxu1 %vm934_vm0, %v935_v6  ;;  %v380_v6 = vcvt.f32.s32 %v1066_v10  ;;  %v358_v10 = vsel %vm357_vm1, %v355_v2, %v356_v5 }
 0x453   :  { %v321_v52 = vmul.f32 %v320_v50, %v320_v50  ;;  %v359_v15 = vrot.slane %v358_v10, 1 }
 0x454   :  { %v381_v61 = vshll.u32 %v380_v6, 16 }
 0x455   :  { %820 = vmatmul.mubr.msk.f32.vlgmr.msra.gmra.mrb[6].mxu1 %vm563_vm14, %v25_v9  ;;  %v322_v53 = vsel %vm219_vm4, %v321_v52, 0.0  ;;  %vm360_vm3 = vcmp.lt.s32.totalorder %v358_v10, %v359_v15 }
 0x456   :  { %323 = vadd.xlane.f32.xlu1 %v322_v53  ;;  %v382_v63 = vadd.s32 %v381_v61, %v379_v59  ;;  %v361_v20 = vsel %vm360_vm3, %v358_v10, %v359_v15 }
 0x458   :  { %v383_v1 = vrot.slane %v382_v63, 4 }
 0x45a   :  { %vm384_vm0 = vcmp.lt.s32.totalorder %v382_v63, %v383_v1 }
 0x45b   :  { %v385_v4 = vsel %vm384_vm0, %v382_v63, %v383_v1 }
 0x45c   :  { %v1138_v54 = vpop.f32.mrb[2].mxu0  ;;  %v386_v7 = vrot.slane %v385_v4, 2 }
 0x45d   :  { %v1140_v40 = vpop.f32.mrb[3].mxu0 }
 0x45e   :  { %vm387_vm2 = vcmp.lt.s32.totalorder %v385_v4, %v386_v7 }
 0x45f   :  { %v388_v13 = vsel %vm387_vm2, %v385_v4, %v386_v7 }
 0x460   :  { %v389_v17 = vrot.slane %v388_v13, 1 }
 0x462   :  { %vm390_vm4 = vcmp.lt.s32.totalorder %v388_v13, %v389_v17 }
 0x463   :  { %v391_v21 = vsel %vm390_vm4, %v388_v13, %v389_v17 }
 0x4e3   :  { %v324_v8 = vpop.xlane.xlu1 %323 }
 0x4e4   :  { %v325_v11 = vrot.slane %v324_v8, 4 }
 0x4e6   :  { %v326_v12 = vadd.f32 %v325_v11, %v324_v8 }
 0x4e8   :  { %v327_v14 = vrot.slane %v326_v12, 2 }
 0x4ea   :  { %v328_v16 = vadd.f32 %v327_v14, %v326_v12 }
 0x4ec   :  { %v329_v18 = vrot.slane %v328_v16, 1 }
 0x4ee   :  { %v330_v19 = vadd.f32 %v329_v18, %v328_v16 }
 0x4f0   :  { %871 = vpush %v330_v19 }
 0x4f1   :  { %873 = vpush %v361_v20 }
 0x4f2   :  { %875 = vpush %v391_v21 }
 0x521   :  { %s872_s1 = spop %871 }
 0x522   :  { %s332_s15 = smul.f32 0.015625, %s872_s1  ;;  %s874_s16 = spop %873 }
 0x523   :  { %364 = sst [smem:[#allocation5]] %s874_s16  ;;  %s876_s0 = spop %875 }
 0x524   :  { %334 = sst [smem:[#allocation6]] %s332_s15  ;;  %v559_v22 = vpop.f32.mrb[4].mxu1 }
 0x525   :  { %394 = sst [smem:[#allocation5 + $0x1]] %s876_s0  ;;  %v814_v23 = vpop.f32.mrb[5].mxu1 }
 0x526   :  { %894 = shalt.err (!%p891_p2)
}
 0x527   :  { %s936_s24 = smov [#allocation5]   ;;  %s895_s29 = scalar_lea.hbm %s1195_s6, 16 }
 0x528   :  { %674 = dma.smem_to_hbm %s936_s24, 16, %s1194_s5, [#allocation4]  }
 0x529   :  { %p896_p3 = scmp.ne.s32.totalorder %s1195_s6, %s895_s29  ;;  %p899_p4 = scmp.lt.u32.totalorder %s895_s29, %s1195_s6 }
 0x52b   :  { %p901_p5 = pnand %p899_p4, %p896_p3 }
 0x52d   :  { %904 = shalt.err (!%p901_p5)
}
 0x52e   :  { %s937_s10 = smov [#allocation6]   ;;  %v633_v24 = vpop.f32.mrb[6].mxu1  ;;  %v706_v25 = vld [vmem:[%s1191_s2 + $0x70] ss:$0 sm:$0xff]  ;;  %v651_v28 = vsub.s32 1, %v1049_v49  ;;  %v645_v29 = vsub.s32 0, %v1049_v49 }
 0x52f   :  { %682 = dma.smem_to_hbm %s937_s10, 16, %s1195_s6, [#allocation7]   ;;  %v634_v26 = vadd.f32 %v633_v24, %v559_v22  ;;  %v821_v27 = vpop.f32.mrb[7].mxu1 }
 0x530   :  { %s938_s13 = smov [#allocation2]  }
 0x531   :  { %v642_v30 = vadd.f32 %v706_v25, %v634_v26  ;;  %s660_s14 = sshll.u32 %s938_s13, 4  ;;  %s661_s14 = int_to_ptr.vmem [resolvable:$true] %s660_s14 }
 0x532   :  { %s905_s2 = scalar_lea.vmem %s661_s14, 256  ;;  %p910_p7 = scmp.lt.s32.totalorder %s661_s14, %s661_s14 }
 0x533   :  { %v652_v31 = vrot.slane %v642_v30, %v651_v28  ;;  %v646_v32 = vrot.slane %v642_v30, %v645_v29  ;;  %p906_p6 = scmp.ne.s32.totalorder %s661_s14, %s905_s2  ;;  %p911_p8 = scmp.lt.s32.totalorder %s905_s2, %s905_s2 }
 0x535   :  { %v653_v33 = vadd.f32 %v1138_v54, %v652_v31  ;;  %v647_v34 = vadd.f32 %v646_v32, %v1140_v40  ;;  %p912_p9 = por %p911_p8, %p910_p7 }
 0x537   :  { %654 = vst.msk [vmem:[#allocation2 + $0x8] sm:$0xff] %vm563_vm14, %v653_v33  ;;  %648 = vst.msk [vmem:[#allocation2] sm:$0xff] %vm563_vm14, %v647_v34  ;;  %p913_p10 = pnand %p912_p9, %p906_p6 }
 0x539   :  { %916 = shalt.err (!%p913_p10)
}
 0x53a   :  { %s917_s15 = scalar_lea.hbm %s1193_s4, 256 }
 0x53b   :  { %p918_p11 = scmp.ne.s32.totalorder %s1193_s4, %s917_s15  ;;  %p921_p12 = scmp.lt.u32.totalorder %s917_s15, %s1193_s4 }
 0x53d   :  { %p923_p13 = pnand %p921_p12, %p918_p11 }
 0x53f   :  { %926 = shalt.err (!%p923_p13)
}
 0x540   :  { %s939_s19 = smov 128   ;;  %s940_s20 = smov 8  }
 0x541   :  { %666 = dma.vmem_to_hbm [thread:$0]  %s661_s14, 256, %s1193_s4, [#allocation3], %s939_s19, %s939_s19, %s940_s20  }
 0x542   :  { %927 = dma.done.wait [#allocation3], 256  }
 0x543   :  { %928 = vsyncadd [#allocation3], 4294967040 }
 0x544   :  { %929 = dma.done.wait [#allocation4], 16  }
 0x545   :  { %930 = vsyncadd [#allocation4], 4294967280 }
 0x546   :  { %931 = dma.done.wait [#allocation7], 16  }
 0x547   :  { %932 = vsyncadd [#allocation7], 4294967280 }
 0x548   :  { %692 = sfence }
 0x549   :  { %693 = vsyncpa [#allocation3], 1 }
 0x54a   :  { %694 = vsyncpa [#allocation4], 1 }
 0x54b   :  { %695 = vsyncpa [#allocation7], 1 }

</bundles_post_ra>
